<compile_context>
chip_gen: v7x
topology: tpu7x:2x2x1
jax: 0.10.0
libtpu: 0.0.40
codegen_flags: <defaults>
</compile_context>

<pallas_src>
import numpy as np
import jax
import jax.numpy as jnp
from jax import lax
from jax.experimental import pallas as pl
from jax.experimental.pallas import tpu as pltpu


_SMALL_ROWS = 14  # 1 score + 1 index + 3 xyz + 9 rot


# ----------------------------------------------------------------------------
# helpers that mirror the original GraspNet utility functions
# ----------------------------------------------------------------------------
def generate_grasp_views(num_views, phi=(np.sqrt(5) - 1) / 2, r=1.0):
    """Fibonacci-sphere view directions, shape (num_views, 3), float32."""
    i = np.arange(num_views)
    zi = (2.0 * i + 1.0) / num_views - 1.0
    xi = np.sqrt(1.0 - zi ** 2) * np.cos(2.0 * i * np.pi * phi)
    yi = np.sqrt(1.0 - zi ** 2) * np.sin(2.0 * i * np.pi * phi)
    views = r * np.stack([xi, yi, zi], axis=-1)
    return jnp.asarray(views, dtype=jnp.float32)


def _pick_seed_tile(n, batch):
    """Largest lane-dense seed tile (multiple of 128, capped at 512) dividing n.

    Keeps batch * (n // tile) >= 2 whenever possible so both TensorCores of a
    v7x chip get a grid step; the rotation tail's vreg pressure caps the tile.
    """
    if n % 128 != 0:
        return n                      # full-extent block (legal, just lane-sparse)
    for cand in (512, 384, 256, 128):
        if n % cand == 0 and (batch * (n // cand) >= 2 or cand == 128):
            return cand
    return 128


# ----------------------------------------------------------------------------
# Pallas kernel: 3x 1x1 conv (BN folded, bf16 MXU / f32 accumulate), argmax
# over views, exact f32 template gather and 3x3 approach-rotation; seeds stay
# on the lane axis everywhere and every store is lane-dense.
# ----------------------------------------------------------------------------
def approachnet_kernel(x_ref, w1_ref, b1_ref, w2_ref, b2_ref, w3_ref, b3_ref,
                       tmplc_ref, feat_ref, small_ref):
    num_view = tmplc_ref.shape[1]
    v2 = feat_ref.shape[1]            # 2 + num_view (unpadded output rows)

    # f32 block straight from HBM; cast to bf16 in-kernel for the MXU only.
    x = x_ref[0].astype(jnp.bfloat16)                          # (C, TN)

    # conv1 + bn1 + relu (BN folded), conv2 + bn2 + relu, conv3.
    h1 = jnp.dot(w1_ref[...], x, preferred_element_type=jnp.float32) + b1_ref[...]
    h1 = jnp.maximum(h1, 0.0).astype(jnp.bfloat16)
    h2 = jnp.dot(w2_ref[...], h1, preferred_element_type=jnp.float32) + b2_ref[...]
    h2 = jnp.maximum(h2, 0.0).astype(jnp.bfloat16)
    f3 = jnp.dot(w3_ref[...], h2, preferred_element_type=jnp.float32) + b3_ref[...]

    # only the meaningful rows [view scores..., objectness(2)] go back to HBM
    feat_ref[0] = f3[:v2]                                      # (V2, TN) lane-dense

    # top view (max + first-argmax) over the view rows (sublane axis here)
    vs = f3[:num_view, :]                                      # (V, TN), starts at row 0
    vmax = jnp.max(vs, axis=0, keepdims=True)                  # (1, TN)
    iota = lax.broadcasted_iota(jnp.int32, vs.shape, 0)        # (V, TN)
    inds = jnp.min(jnp.where(vs == vmax, iota, num_view),
                   axis=0, keepdims=True)                      # (1, TN) int32
    small_ref[0, 0:2, :] = jnp.concatenate(
        [vmax, inds.astype(jnp.float32)], axis=0)              # rows: score, index

    # exact f32 template gather (select + sublane reduce).  Kept off the MXU on
    # purpose: vp_xyz must be bit-exact tmpl[inds] (review correctness note).
    onehot = iota == inds                                      # one True per column

    def gather(c):
        return jnp.sum(jnp.where(onehot, tmplc_ref[c], 0.0),
                       axis=0, keepdims=True)                  # (1, TN)

    vx, vy, vz = gather(0), gather(1), gather(2)
    small_ref[0, 2:5, :] = jnp.concatenate([vx, vy, vz], axis=0)   # rows: vp_xyz

    # batch_viewpoint_params_to_matrix(-vp, angle=0), seeds on the lane axis
    tx0, tx1, tx2 = -vx, -vy, -vz
    # template views are unit vectors, so this norm is never zero
    inv_nx = lax.rsqrt(tx0 * tx0 + tx1 * tx1 + tx2 * tx2)
    ax0, ax1, ax2 = tx0 * inv_nx, tx1 * inv_nx, tx2 * inv_nx

    ay0, ay1 = -tx1, tx0
    zero_mask = (tx0 == 0.0) & (tx1 == 0.0)                    # norm([-tx1, tx0, 0]) == 0
    ay1 = jnp.where(zero_mask, 1.0, ay1)
    inv_ny = lax.rsqrt(ay0 * ay0 + ay1 * ay1)
    ay0, ay1 = ay0 * inv_ny, ay1 * inv_ny
    ay2 = jnp.zeros_like(ay0)

    # axis_z = cross(axis_x, axis_y), with ay2 == 0 folded in
    az0 = -ax2 * ay1
    az1 = ax2 * ay0
    az2 = ax0 * ay1 - ax1 * ay0

    # R row-major, columns = (ax, ay, az); grouped stores keep liveness short
    small_ref[0, 5:8, :] = jnp.concatenate([ax0, ay0, az0], axis=0)
    small_ref[0, 8:11, :] = jnp.concatenate([ax1, ay1, az1], axis=0)
    small_ref[0, 11:14, :] = jnp.concatenate([ax2, ay2, az2], axis=0)


def approach_net_forward(seed_xyz, seed_features, params, num_view,
                         lane_major=False):
    """seed_xyz: (B, N, 3)  seed_features: (B, C, N) f32  -> end_points dict."""
    B, N, _ = seed_xyz.shape
    C = seed_features.shape[1]
    V2p = params["w2"].shape[0]                                # padded 2 + num_view
    V2 = 2 + num_view
    assert num_view < (1 << 24)  # top-view index round-trips exactly through f32

    TN = _pick_seed_tile(N, B)
    grid = (B, N // TN)

    # Weights cast to bf16 once (tiny); the activation stays f32 — it is read
    # directly by the kernel and cast there (no extra HBM pass for a cast op).
    w1 = params["w1"].astype(jnp.bfloat16)
    w2 = params["w2"].astype(jnp.bfloat16)
    w3 = params["w3"].astype(jnp.bfloat16)
    b1, b2, b3 = params["b1"], params["b2"], params["b3"]
    tmplc = jnp.transpose(generate_grasp_views(num_view))[:, :, None]  # (3, V, 1)

    def const(shape):
        return pl.BlockSpec(shape, lambda b, n: (0,) * len(shape))

    cost = pl.CostEstimate(
        flops=2 * B * N * (C * C + V2p * C + V2p * V2p),
        transcendentals=2 * B * N,
        bytes_accessed=4 * B * N * (C + V2 + _SMALL_ROWS),
    )

    feat, small = pl.pallas_call(
        approachnet_kernel,
        grid=grid,
        in_specs=[
            pl.BlockSpec((1, C, TN), lambda b, n: (b, 0, n)),
            const((C, C)), const((C, 1)),
            const((V2p, C)), const((V2p, 1)),
            const((V2p, V2p)), const((V2p, 1)),
            const((3, num_view, 1)),
        ],
        out_specs=[
            pl.BlockSpec((1, V2, TN), lambda b, n: (b, 0, n)),
            pl.BlockSpec((1, _SMALL_ROWS, TN), lambda b, n: (b, 0, n)),
        ],
        out_shape=[
            jax.ShapeDtypeStruct((B, V2, N), jnp.float32),
            jax.ShapeDtypeStruct((B, _SMALL_ROWS, N), jnp.float32),
        ],
        compiler_params=pltpu.CompilerParams(
            dimension_semantics=("parallel", "parallel"),
            vmem_limit_bytes=32 * 1024 * 1024),
        cost_estimate=cost,
    )(seed_features, w1, b1, w2, b2, w3, b3, tmplc)

    end_points = {}
    # kernel channel order: [view scores (num_view), objectness (2)]
    end_points["objectness_score"] = feat[:, num_view:num_view + 2, :]       # (B,2,N)
    end_points["grasp_top_view_score"] = small[:, 0, :]                      # (B,N)
    end_points["grasp_top_view_inds"] = small[:, 1, :].astype(jnp.int32)     # (B,N)
    if lane_major:
        # lane-major outputs: no extra HBM transpose passes (consumer must
        # accept (B, V, N) / (B, 3, N) / (B, 9, N) layouts).
        end_points["view_score"] = feat[:, :num_view, :]
        end_points["grasp_top_view_xyz"] = small[:, 2:5, :]
        end_points["grasp_top_view_rot"] = small[:, 5:14, :]
    else:
        # PyTorch-parity layouts (each costs one extra HBM pass; fuse into the
        # downstream consumer if possible).
        end_points["view_score"] = jnp.transpose(feat[:, :num_view, :], (0, 2, 1))
        end_points["grasp_top_view_xyz"] = jnp.transpose(small[:, 2:5, :], (0, 2, 1))
        end_points["grasp_top_view_rot"] = jnp.transpose(
            small[:, 5:14, :], (0, 2, 1)).reshape(B, N, 3, 3)
    return end_points


# ----------------------------------------------------------------------------
# deterministic parameter construction (eval-mode BN folded into the convs,
# conv2/conv3 channels permuted so views come first, padded to a multiple of 8)
# ----------------------------------------------------------------------------
def make_params(key, in_dim, num_view):
    V2 = 2 + num_view
    V2p = ((V2 + 7) // 8) * 8
    eps = 1e-5
    ks = jax.random.split(key, 16)

    # raw conv weights (PyTorch Conv1d weight (out, in, 1) treated as (out, in))
    W1 = 0.1 * jax.random.normal(ks[0], (in_dim, in_dim), jnp.float32)
    c1b = 0.1 * jax.random.normal(ks[1], (in_dim,), jnp.float32)
    W2 = 0.1 * jax.random.normal(ks[2], (V2, in_dim), jnp.float32)
    c2b = 0.1 * jax.random.normal(ks[3], (V2,), jnp.float32)
    W3 = 0.1 * jax.random.normal(ks[4], (V2, V2), jnp.float32)
    c3b = 0.1 * jax.random.normal(ks[5], (V2,), jnp.float32)

    # BN params + running stats (eval mode)
    g1 = 1.0 + 0.1 * jax.random.normal(ks[6], (in_dim,), jnp.float32)
    beta1 = 0.1 * jax.random.normal(ks[7], (in_dim,), jnp.float32)
    rm1 = 0.1 * jax.random.normal(ks[8], (in_dim,), jnp.float32)
    rv1 = 0.5 + jax.random.uniform(ks[9], (in_dim,), jnp.float32)

    g2 = 1.0 + 0.1 * jax.random.normal(ks[10], (V2,), jnp.float32)
    beta2 = 0.1 * jax.random.normal(ks[11], (V2,), jnp.float32)
    rm2 = 0.1 * jax.random.normal(ks[12], (V2,), jnp.float32)
    rv2 = 0.5 + jax.random.uniform(ks[13], (V2,), jnp.float32)

    # fold eval-mode BN:  y = ((x W^T + b) - rm) / sqrt(rv+eps) * g + beta
    s1 = g1 / jnp.sqrt(rv1 + eps)
    w1f = W1 * s1[:, None]                        # (out, in) for left-multiply
    b1f = (c1b - rm1) * s1 + beta1

    s2 = g2 / jnp.sqrt(rv2 + eps)
    w2f = W2 * s2[:, None]
    b2f = (c2b - rm2) * s2 + beta2

    # permute conv2/conv3 channels: [views..., objectness(2)], zero-pad to V2p
    perm = jnp.concatenate([jnp.arange(2, V2), jnp.arange(0, 2)])
    w2p = jnp.zeros((V2p, in_dim), jnp.float32).at[:V2].set(w2f[perm])
    b2p = jnp.zeros((V2p,), jnp.float32).at[:V2].set(b2f[perm])
    w3p = jnp.zeros((V2p, V2p), jnp.float32).at[:V2, :V2].set(W3[perm][:, perm])
    b3p = jnp.zeros((V2p,), jnp.float32).at[:V2].set(c3b[perm])

    return dict(w1=w1f, b1=b1f[:, None],
                w2=w2p, b2=b2p[:, None],
                w3=w3p, b3=b3p[:, None])


# ----------------------------------------------------------------------------
# pure-JAX / numpy references for correctness checks
# ----------------------------------------------------------------------------
def reference_feat(seed_features, params):
    """Mirrors the kernel's bf16-MXU / f32-accumulate conv stack."""
    xb = seed_features.astype(jnp.bfloat16)
    w1 = params["w1"].astype(jnp.bfloat16)
    w2 = params["w2"].astype(jnp.bfloat16)
    w3 = params["w3"].astype(jnp.bfloat16)
    h1 = jnp.maximum(
        jnp.einsum("oc,bcn->bon", w1, xb, preferred_element_type=jnp.float32)
        + params["b1"][None], 0.0).astype(jnp.bfloat16)
    h2 = jnp.maximum(
        jnp.einsum("oc,bcn->bon", w2, h1, preferred_element_type=jnp.float32)
        + params["b2"][None], 0.0).astype(jnp.bfloat16)
    f3 = (jnp.einsum("oc,bcn->bon", w3, h2, preferred_element_type=jnp.float32)
          + params["b3"][None])
    return f3                                                # (B, V2p, N)


def reference_rot_from_xyz(vp):
    """numpy version of batch_viewpoint_params_to_matrix(-vp, 0)."""
    tx = -vp
    ax = tx / np.linalg.norm(tx, axis=-1, keepdims=True)
    ay = np.stack([-tx[..., 1], tx[..., 0], np.zeros_like(tx[..., 0])], axis=-1)
    mask = np.linalg.norm(ay, axis=-1) == 0
    ay[..., 1] = np.where(mask, 1.0, ay[..., 1])
    ay = ay / np.linalg.norm(ay, axis=-1, keepdims=True)
    az = np.cross(ax, ay)
    return np.stack([ax, ay, az], axis=-1)                   # columns = ax, ay, az


# ----------------------------------------------------------------------------
if __name__ == "__main__":
    B, num_seed, C, num_view = 2, 256, 32, 8

    key = jax.random.PRNGKey(0)
    kx, kf, kp = jax.random.split(key, 3)
    seed_xyz = jax.random.normal(kx, (B, num_seed, 3), jnp.float32)
    seed_features = jax.random.normal(kf, (B, C, num_seed), jnp.float32)
    params = make_params(kp, C, num_view)

    end_points = approach_net_forward(seed_xyz, seed_features, params, num_view)
    jax.block_until_ready(end_points)

    # ---- conv stack vs bf16-mirrored JAX reference -------------------------
    f3_ref = np.asarray(reference_feat(seed_features, params))          # (B, V2p, N)
    view_score = np.asarray(end_points["view_score"])                   # (B, N, V)
    obj = np.asarray(end_points["objectness_score"])                    # (B, 2, N)
    np.testing.assert_allclose(
        view_score, np.transpose(f3_ref[:, :num_view, :], (0, 2, 1)),
        rtol=1e-3, atol=1e-3)
    np.testing.assert_allclose(
        obj, f3_ref[:, num_view:num_view + 2, :], rtol=1e-3, atol=1e-3)

    # ---- internal consistency of argmax / gather / rotation path -----------
    score = np.asarray(end_points["grasp_top_view_score"])
    inds = np.asarray(end_points["grasp_top_view_inds"])
    xyz = np.asarray(end_points["grasp_top_view_xyz"])
    rot = np.asarray(end_points["grasp_top_view_rot"])

    np.testing.assert_allclose(score, view_score.max(axis=-1), rtol=0, atol=1e-6)
    np.testing.assert_array_equal(inds, view_score.argmax(axis=-1))
    tmpl = np.asarray(generate_grasp_views(num_view))
    np.testing.assert_allclose(xyz, tmpl[inds], rtol=0, atol=1e-6)
    np.testing.assert_allclose(rot, reference_rot_from_xyz(xyz), rtol=1e-4, atol=1e-4)

    print("KERNEL_OK")
</pallas_src>

<mosaic_0001>
module attributes {stable_mosaic.version = 11 : i64} {
  func.func @approachnet_kernel(%arg0: i32, %arg1: i32, %arg2: memref<1x32x256xf32, #tpu.memory_space<vmem>>, %arg3: memref<32x32xbf16, #tpu.memory_space<vmem>>, %arg4: memref<32x1xf32, #tpu.memory_space<vmem>>, %arg5: memref<16x32xbf16, #tpu.memory_space<vmem>>, %arg6: memref<16x1xf32, #tpu.memory_space<vmem>>, %arg7: memref<16x16xbf16, #tpu.memory_space<vmem>>, %arg8: memref<16x1xf32, #tpu.memory_space<vmem>>, %arg9: memref<3x8x1xf32, #tpu.memory_space<vmem>>, %arg10: memref<1x10x256xf32, #tpu.memory_space<vmem>>, %arg11: memref<1x14x256xf32, #tpu.memory_space<vmem>>) attributes {dimension_semantics = [#tpu.dimension_semantics<parallel>, #tpu.dimension_semantics<parallel>], iteration_bounds = array<i64: 2, 1>, scalar_prefetch = 0 : i64, scratch_operands = 0 : i64, tpu.core_type = #tpu.core_type<tc>, window_params = [{transform_indices = @transform_0, window_bounds = array<i64: 1, 32, 256>}, {pipeline_mode = #tpu.pipeline_mode<synchronous>, transform_indices = @transform_1, window_bounds = array<i64: 32, 32>}, {pipeline_mode = #tpu.pipeline_mode<synchronous>, transform_indices = @transform_2, window_bounds = array<i64: 32, 1>}, {pipeline_mode = #tpu.pipeline_mode<synchronous>, transform_indices = @transform_3, window_bounds = array<i64: 16, 32>}, {pipeline_mode = #tpu.pipeline_mode<synchronous>, transform_indices = @transform_4, window_bounds = array<i64: 16, 1>}, {pipeline_mode = #tpu.pipeline_mode<synchronous>, transform_indices = @transform_5, window_bounds = array<i64: 16, 16>}, {pipeline_mode = #tpu.pipeline_mode<synchronous>, transform_indices = @transform_6, window_bounds = array<i64: 16, 1>}, {pipeline_mode = #tpu.pipeline_mode<synchronous>, transform_indices = @transform_7, window_bounds = array<i64: 3, 8, 1>}, {transform_indices = @transform_8, window_bounds = array<i64: 1, 10, 256>}, {transform_indices = @transform_9, window_bounds = array<i64: 1, 14, 256>}]} {
    %c0 = arith.constant 0 : index
    %c0_0 = arith.constant 0 : index
    %c0_1 = arith.constant 0 : index
    %0 = vector.load %arg2[%c0, %c0_0, %c0_1] : memref<1x32x256xf32, #tpu.memory_space<vmem>>, vector<1x32x256xf32>
    %1 = vector.shape_cast %0 : vector<1x32x256xf32> to vector<32x256xf32>
    %2 = arith.truncf %1 : vector<32x256xf32> to vector<32x256xbf16>
    %c0_2 = arith.constant 0 : index
    %c0_3 = arith.constant 0 : index
    %3 = vector.load %arg3[%c0_2, %c0_3] : memref<32x32xbf16, #tpu.memory_space<vmem>>, vector<32x32xbf16>
    %cst = arith.constant dense<0.000000e+00> : vector<32x256xf32>
    %4 = tpu.matmul %3, %2, %cst {dimension_numbers = #tpu.dot_dimension_numbers<[1], [0], [0], [1], [0, 0, 1, 1], [], []>} : vector<32x32xbf16>, vector<32x256xbf16>, vector<32x256xf32> -> vector<32x256xf32>
    %c0_4 = arith.constant 0 : index
    %c0_5 = arith.constant 0 : index
    %5 = vector.load %arg4[%c0_4, %c0_5] : memref<32x1xf32, #tpu.memory_space<vmem>>, vector<32x1xf32>
    %6 = vector.broadcast %5 : vector<32x1xf32> to vector<32x256xf32>
    %7 = arith.addf %4, %6 : vector<32x256xf32>
    %cst_6 = arith.constant 0.000000e+00 : f32
    %8 = vector.broadcast %cst_6 : f32 to vector<32x256xf32>
    %9 = arith.maximumf %7, %8 : vector<32x256xf32>
    %10 = arith.truncf %9 : vector<32x256xf32> to vector<32x256xbf16>
    %c0_7 = arith.constant 0 : index
    %c0_8 = arith.constant 0 : index
    %11 = vector.load %arg5[%c0_7, %c0_8] : memref<16x32xbf16, #tpu.memory_space<vmem>>, vector<16x32xbf16>
    %cst_9 = arith.constant dense<0.000000e+00> : vector<16x256xf32>
    %12 = tpu.matmul %11, %10, %cst_9 {dimension_numbers = #tpu.dot_dimension_numbers<[1], [0], [0], [1], [0, 0, 1, 1], [], []>} : vector<16x32xbf16>, vector<32x256xbf16>, vector<16x256xf32> -> vector<16x256xf32>
    %c0_10 = arith.constant 0 : index
    %c0_11 = arith.constant 0 : index
    %13 = vector.load %arg6[%c0_10, %c0_11] : memref<16x1xf32, #tpu.memory_space<vmem>>, vector<16x1xf32>
    %14 = vector.broadcast %13 : vector<16x1xf32> to vector<16x256xf32>
    %15 = arith.addf %12, %14 : vector<16x256xf32>
    %cst_12 = arith.constant 0.000000e+00 : f32
    %16 = vector.broadcast %cst_12 : f32 to vector<16x256xf32>
    %17 = arith.maximumf %15, %16 : vector<16x256xf32>
    %18 = arith.truncf %17 : vector<16x256xf32> to vector<16x256xbf16>
    %c0_13 = arith.constant 0 : index
    %c0_14 = arith.constant 0 : index
    %19 = vector.load %arg7[%c0_13, %c0_14] : memref<16x16xbf16, #tpu.memory_space<vmem>>, vector<16x16xbf16>
    %cst_15 = arith.constant dense<0.000000e+00> : vector<16x256xf32>
    %20 = tpu.matmul %19, %18, %cst_15 {dimension_numbers = #tpu.dot_dimension_numbers<[1], [0], [0], [1], [0, 0, 1, 1], [], []>} : vector<16x16xbf16>, vector<16x256xbf16>, vector<16x256xf32> -> vector<16x256xf32>
    %c0_16 = arith.constant 0 : index
    %c0_17 = arith.constant 0 : index
    %21 = vector.load %arg8[%c0_16, %c0_17] : memref<16x1xf32, #tpu.memory_space<vmem>>, vector<16x1xf32>
    %22 = vector.broadcast %21 : vector<16x1xf32> to vector<16x256xf32>
    %23 = arith.addf %20, %22 : vector<16x256xf32>
    %24 = vector.extract_strided_slice %23 {offsets = [0, 0], sizes = [10, 256], strides = [1, 1]} : vector<16x256xf32> to vector<10x256xf32>
    %c0_18 = arith.constant 0 : index
    %c0_19 = arith.constant 0 : index
    %c0_20 = arith.constant 0 : index
    %25 = vector.load %arg10[%c0_18, %c0_19, %c0_20] : memref<1x10x256xf32, #tpu.memory_space<vmem>>, vector<1x10x256xf32>
    %26 = vector.shape_cast %25 : vector<1x10x256xf32> to vector<10x256xf32>
    %27 = vector.shape_cast %24 : vector<10x256xf32> to vector<1x10x256xf32>
    tpu.vector_store %arg10[%c0_18, %c0_19, %c0_20], %27 {strides = array<i32>} : memref<1x10x256xf32, #tpu.memory_space<vmem>>, vector<1x10x256xf32>,
    %28 = vector.extract_strided_slice %23 {offsets = [0, 0], sizes = [8, 256], strides = [1, 1]} : vector<16x256xf32> to vector<8x256xf32>
    %cst_21 = arith.constant dense<0xFF800000> : vector<256xf32>
    %29 = vector.multi_reduction <maximumf>, %28, %cst_21 [0] : vector<8x256xf32> to vector<256xf32>
    %30 = vector.shape_cast %29 : vector<256xf32> to vector<1x256xf32>
    %31 = tpu.iota {dimensions = array<i32: 0>} : vector<8x256xi32>
    %32 = vector.broadcast %30 : vector<1x256xf32> to vector<8x256xf32>
    %33 = arith.cmpf oeq, %28, %32 : vector<8x256xf32>
    %c8_i32 = arith.constant 8 : i32
    %34 = vector.broadcast %c8_i32 : i32 to vector<8x256xi32>
    %35 = arith.select %33, %31, %34 : vector<8x256xi1>, vector<8x256xi32>
    %cst_22 = arith.constant dense<2147483647> : vector<256xi32>
    %36 = vector.multi_reduction <minsi>, %35, %cst_22 [0] : vector<8x256xi32> to vector<256xi32>
    %37 = vector.shape_cast %36 : vector<256xi32> to vector<1x256xi32>
    %38 = arith.sitofp %37 : vector<1x256xi32> to vector<1x256xf32>
    %39 = tpu.concatenate %30, %38 in 0 : vector<1x256xf32>, vector<1x256xf32> -> vector<2x256xf32>
    %c0_23 = arith.constant 0 : index
    %c0_24 = arith.constant 0 : index
    %c0_25 = arith.constant 0 : index
    %40 = vector.load %arg11[%c0_23, %c0_24, %c0_25] : memref<1x14x256xf32, #tpu.memory_space<vmem>>, vector<1x2x256xf32>
    %41 = vector.shape_cast %40 : vector<1x2x256xf32> to vector<2x256xf32>
    %42 = vector.shape_cast %39 : vector<2x256xf32> to vector<1x2x256xf32>
    tpu.vector_store %arg11[%c0_23, %c0_24, %c0_25], %42 {strides = array<i32>} : memref<1x14x256xf32, #tpu.memory_space<vmem>>, vector<1x2x256xf32>,
    %43 = vector.broadcast %37 : vector<1x256xi32> to vector<8x256xi32>
    %44 = arith.cmpi eq, %31, %43 : vector<8x256xi32>
    %c0_26 = arith.constant 0 : index
    %c0_27 = arith.constant 0 : index
    %c0_28 = arith.constant 0 : index
    %45 = vector.load %arg9[%c0_26, %c0_27, %c0_28] : memref<3x8x1xf32, #tpu.memory_space<vmem>>, vector<1x8x1xf32>
    %46 = vector.shape_cast %45 : vector<1x8x1xf32> to vector<8x1xf32>
    %cst_29 = arith.constant 0.000000e+00 : f32
    %47 = vector.shape_cast %46 : vector<8x1xf32> to vector<8x1xf32>
    %48 = vector.broadcast %47 : vector<8x1xf32> to vector<8x256xf32>
    %49 = vector.broadcast %cst_29 : f32 to vector<8x256xf32>
    %50 = arith.select %44, %48, %49 : vector<8x256xi1>, vector<8x256xf32>
    %cst_30 = arith.constant dense<0.000000e+00> : vector<256xf32>
    %51 = vector.multi_reduction <add>, %50, %cst_30 [0] : vector<8x256xf32> to vector<256xf32>
    %52 = vector.shape_cast %51 : vector<256xf32> to vector<1x256xf32>
    %c1 = arith.constant 1 : index
    %c0_31 = arith.constant 0 : index
    %c0_32 = arith.constant 0 : index
    %53 = vector.load %arg9[%c1, %c0_31, %c0_32] : memref<3x8x1xf32, #tpu.memory_space<vmem>>, vector<1x8x1xf32>
    %54 = vector.shape_cast %53 : vector<1x8x1xf32> to vector<8x1xf32>
    %cst_33 = arith.constant 0.000000e+00 : f32
    %55 = vector.shape_cast %54 : vector<8x1xf32> to vector<8x1xf32>
    %56 = vector.broadcast %55 : vector<8x1xf32> to vector<8x256xf32>
    %57 = vector.broadcast %cst_33 : f32 to vector<8x256xf32>
    %58 = arith.select %44, %56, %57 : vector<8x256xi1>, vector<8x256xf32>
    %cst_34 = arith.constant dense<0.000000e+00> : vector<256xf32>
    %59 = vector.multi_reduction <add>, %58, %cst_34 [0] : vector<8x256xf32> to vector<256xf32>
    %60 = vector.shape_cast %59 : vector<256xf32> to vector<1x256xf32>
    %c2 = arith.constant 2 : index
    %c0_35 = arith.constant 0 : index
    %c0_36 = arith.constant 0 : index
    %61 = vector.load %arg9[%c2, %c0_35, %c0_36] : memref<3x8x1xf32, #tpu.memory_space<vmem>>, vector<1x8x1xf32>
    %62 = vector.shape_cast %61 : vector<1x8x1xf32> to vector<8x1xf32>
    %cst_37 = arith.constant 0.000000e+00 : f32
    %63 = vector.shape_cast %62 : vector<8x1xf32> to vector<8x1xf32>
    %64 = vector.broadcast %63 : vector<8x1xf32> to vector<8x256xf32>
    %65 = vector.broadcast %cst_37 : f32 to vector<8x256xf32>
    %66 = arith.select %44, %64, %65 : vector<8x256xi1>, vector<8x256xf32>
    %cst_38 = arith.constant dense<0.000000e+00> : vector<256xf32>
    %67 = vector.multi_reduction <add>, %66, %cst_38 [0] : vector<8x256xf32> to vector<256xf32>
    %68 = vector.shape_cast %67 : vector<256xf32> to vector<1x256xf32>
    %69 = tpu.concatenate %52, %60, %68 in 0 : vector<1x256xf32>, vector<1x256xf32>, vector<1x256xf32> -> vector<3x256xf32>
    %c0_39 = arith.constant 0 : index
    %c2_40 = arith.constant 2 : index
    %c0_41 = arith.constant 0 : index
    %70 = vector.load %arg11[%c0_39, %c2_40, %c0_41] : memref<1x14x256xf32, #tpu.memory_space<vmem>>, vector<1x3x256xf32>
    %71 = vector.shape_cast %70 : vector<1x3x256xf32> to vector<3x256xf32>
    %72 = vector.shape_cast %69 : vector<3x256xf32> to vector<1x3x256xf32>
    tpu.vector_store %arg11[%c0_39, %c2_40, %c0_41], %72 {strides = array<i32>} : memref<1x14x256xf32, #tpu.memory_space<vmem>>, vector<1x3x256xf32>,
    %cst_42 = arith.constant 0.000000e+00 : f32
    %73 = vector.broadcast %cst_42 : f32 to vector<1x256xf32>
    %74 = arith.subf %73, %52 : vector<1x256xf32>
    %cst_43 = arith.constant 0.000000e+00 : f32
    %75 = vector.broadcast %cst_43 : f32 to vector<1x256xf32>
    %76 = arith.subf %75, %60 : vector<1x256xf32>
    %cst_44 = arith.constant 0.000000e+00 : f32
    %77 = vector.broadcast %cst_44 : f32 to vector<1x256xf32>
    %78 = arith.subf %77, %68 : vector<1x256xf32>
    %79 = arith.mulf %74, %74 : vector<1x256xf32>
    %80 = arith.mulf %76, %76 : vector<1x256xf32>
    %81 = arith.addf %79, %80 : vector<1x256xf32>
    %82 = arith.mulf %78, %78 : vector<1x256xf32>
    %83 = arith.addf %81, %82 : vector<1x256xf32>
    %84 = math.rsqrt %83 : vector<1x256xf32>
    %85 = arith.mulf %74, %84 : vector<1x256xf32>
    %86 = arith.mulf %76, %84 : vector<1x256xf32>
    %87 = arith.mulf %78, %84 : vector<1x256xf32>
    %cst_45 = arith.constant 0.000000e+00 : f32
    %88 = vector.broadcast %cst_45 : f32 to vector<1x256xf32>
    %89 = arith.subf %88, %76 : vector<1x256xf32>
    %cst_46 = arith.constant 0.000000e+00 : f32
    %90 = vector.broadcast %cst_46 : f32 to vector<1x256xf32>
    %91 = arith.cmpf oeq, %74, %90 : vector<1x256xf32>
    %cst_47 = arith.constant 0.000000e+00 : f32
    %92 = vector.broadcast %cst_47 : f32 to vector<1x256xf32>
    %93 = arith.cmpf oeq, %76, %92 : vector<1x256xf32>
    %94 = arith.andi %91, %93 : vector<1x256xi1>
    %cst_48 = arith.constant 1.000000e+00 : f32
    %95 = vector.broadcast %cst_48 : f32 to vector<1x256xf32>
    %96 = arith.select %94, %95, %74 : vector<1x256xi1>, vector<1x256xf32>
    %97 = arith.mulf %89, %89 : vector<1x256xf32>
    %98 = arith.mulf %96, %96 : vector<1x256xf32>
    %99 = arith.addf %97, %98 : vector<1x256xf32>
    %100 = math.rsqrt %99 : vector<1x256xf32>
    %101 = arith.mulf %89, %100 : vector<1x256xf32>
    %102 = arith.mulf %96, %100 : vector<1x256xf32>
    %cst_49 = arith.constant 0.000000e+00 : f32
    %103 = vector.broadcast %cst_49 : f32 to vector<1x256xf32>
    %cst_50 = arith.constant 0.000000e+00 : f32
    %104 = vector.broadcast %cst_50 : f32 to vector<1x256xf32>
    %105 = arith.subf %104, %87 : vector<1x256xf32>
    %106 = arith.mulf %105, %102 : vector<1x256xf32>
    %107 = arith.mulf %87, %101 : vector<1x256xf32>
    %108 = arith.mulf %85, %102 : vector<1x256xf32>
    %109 = arith.mulf %86, %101 : vector<1x256xf32>
    %110 = arith.subf %108, %109 : vector<1x256xf32>
    %111 = tpu.concatenate %85, %101, %106 in 0 : vector<1x256xf32>, vector<1x256xf32>, vector<1x256xf32> -> vector<3x256xf32>
    %c0_51 = arith.constant 0 : index
    %c5 = arith.constant 5 : index
    %c0_52 = arith.constant 0 : index
    %112 = vector.load %arg11[%c0_51, %c5, %c0_52] : memref<1x14x256xf32, #tpu.memory_space<vmem>>, vector<1x3x256xf32>
    %113 = vector.shape_cast %112 : vector<1x3x256xf32> to vector<3x256xf32>
    %114 = vector.shape_cast %111 : vector<3x256xf32> to vector<1x3x256xf32>
    tpu.vector_store %arg11[%c0_51, %c5, %c0_52], %114 {strides = array<i32>} : memref<1x14x256xf32, #tpu.memory_space<vmem>>, vector<1x3x256xf32>,
    %115 = tpu.concatenate %86, %102, %107 in 0 : vector<1x256xf32>, vector<1x256xf32>, vector<1x256xf32> -> vector<3x256xf32>
    %c0_53 = arith.constant 0 : index
    %c8 = arith.constant 8 : index
    %c0_54 = arith.constant 0 : index
    %116 = vector.load %arg11[%c0_53, %c8, %c0_54] : memref<1x14x256xf32, #tpu.memory_space<vmem>>, vector<1x3x256xf32>
    %117 = vector.shape_cast %116 : vector<1x3x256xf32> to vector<3x256xf32>
    %118 = vector.shape_cast %115 : vector<3x256xf32> to vector<1x3x256xf32>
    tpu.vector_store %arg11[%c0_53, %c8, %c0_54], %118 {strides = array<i32>} : memref<1x14x256xf32, #tpu.memory_space<vmem>>, vector<1x3x256xf32>,
    %119 = tpu.concatenate %87, %103, %110 in 0 : vector<1x256xf32>, vector<1x256xf32>, vector<1x256xf32> -> vector<3x256xf32>
    %c0_55 = arith.constant 0 : index
    %c11 = arith.constant 11 : index
    %c0_56 = arith.constant 0 : index
    %120 = vector.load %arg11[%c0_55, %c11, %c0_56] : memref<1x14x256xf32, #tpu.memory_space<vmem>>, vector<1x3x256xf32>
    %121 = vector.shape_cast %120 : vector<1x3x256xf32> to vector<3x256xf32>
    %122 = vector.shape_cast %119 : vector<3x256xf32> to vector<1x3x256xf32>
    tpu.vector_store %arg11[%c0_55, %c11, %c0_56], %122 {strides = array<i32>} : memref<1x14x256xf32, #tpu.memory_space<vmem>>, vector<1x3x256xf32>,
    return
  }
  func.func @transform_0(%arg0: i32, %arg1: i32) -> (i32, i32, i32) {
    %c0_i32 = arith.constant 0 : i32
    %c0_i32_0 = arith.constant 0 : i32
    return %arg0, %c0_i32, %arg1 : i32, i32, i32
  }
  func.func @transform_1(%arg0: i32, %arg1: i32) -> (i32, i32) {
    %c0_i32 = arith.constant 0 : i32
    %c0_i32_0 = arith.constant 0 : i32
    %c0_i32_1 = arith.constant 0 : i32
    return %c0_i32, %c0_i32_0 : i32, i32
  }
  func.func @transform_2(%arg0: i32, %arg1: i32) -> (i32, i32) {
    %c0_i32 = arith.constant 0 : i32
    %c0_i32_0 = arith.constant 0 : i32
    %c0_i32_1 = arith.constant 0 : i32
    return %c0_i32, %c0_i32_0 : i32, i32
  }
  func.func @transform_3(%arg0: i32, %arg1: i32) -> (i32, i32) {
    %c0_i32 = arith.constant 0 : i32
    %c0_i32_0 = arith.constant 0 : i32
    %c0_i32_1 = arith.constant 0 : i32
    return %c0_i32, %c0_i32_0 : i32, i32
  }
  func.func @transform_4(%arg0: i32, %arg1: i32) -> (i32, i32) {
    %c0_i32 = arith.constant 0 : i32
    %c0_i32_0 = arith.constant 0 : i32
    %c0_i32_1 = arith.constant 0 : i32
    return %c0_i32, %c0_i32_0 : i32, i32
  }
  func.func @transform_5(%arg0: i32, %arg1: i32) -> (i32, i32) {
    %c0_i32 = arith.constant 0 : i32
    %c0_i32_0 = arith.constant 0 : i32
    %c0_i32_1 = arith.constant 0 : i32
    return %c0_i32, %c0_i32_0 : i32, i32
  }
  func.func @transform_6(%arg0: i32, %arg1: i32) -> (i32, i32) {
    %c0_i32 = arith.constant 0 : i32
    %c0_i32_0 = arith.constant 0 : i32
    %c0_i32_1 = arith.constant 0 : i32
    return %c0_i32, %c0_i32_0 : i32, i32
  }
  func.func @transform_7(%arg0: i32, %arg1: i32) -> (i32, i32, i32) {
    %c0_i32 = arith.constant 0 : i32
    %c0_i32_0 = arith.constant 0 : i32
    %c0_i32_1 = arith.constant 0 : i32
    %c0_i32_2 = arith.constant 0 : i32
    return %c0_i32, %c0_i32_0, %c0_i32_1 : i32, i32, i32
  }
  func.func @transform_8(%arg0: i32, %arg1: i32) -> (i32, i32, i32) {
    %c0_i32 = arith.constant 0 : i32
    %c0_i32_0 = arith.constant 0 : i32
    return %arg0, %c0_i32, %arg1 : i32, i32, i32
  }
  func.func @transform_9(%arg0: i32, %arg1: i32) -> (i32, i32, i32) {
    %c0_i32 = arith.constant 0 : i32
    %c0_i32_0 = arith.constant 0 : i32
    return %arg0, %c0_i32, %arg1 : i32, i32, i32
  }
}

</mosaic_0001>

<bundles_post_ra>
// kernel: tpu_custom_call.1
= control target key start
LH: loop header
LB: loop body
LE: loop exit
PB: predicated region body
PF: predicated region fallthrough
CT: control target
= control target key end

     0   :  { %15 = vsyncpa [#allocation3], 0  ;;  %s1480_s0 = inlined_call_operand.hbm [shape: f32[2,32,256], index: 0, kind: input, shape index: {}]   ;;  %s1481_s1 = inlined_call_operand.vmem [shape: bf16[32,32], index: 1, kind: input, shape index: {}]   ;;  %s1482_s2 = inlined_call_operand.vmem [shape: f32[32,1], index: 2, kind: input, shape index: {}]   ;;  %s1483_s3 = inlined_call_operand.vmem [shape: bf16[16,32], index: 3, kind: input, shape index: {}]   ;;  %s1484_s4 = inlined_call_operand.vmem [shape: f32[16,1], index: 4, kind: input, shape index: {}]   ;;  %s1485_s5 = inlined_call_operand.vmem [shape: bf16[16,16], index: 5, kind: input, shape index: {}]   ;;  %s1486_s6 = inlined_call_operand.vmem [shape: f32[16,1], index: 6, kind: input, shape index: {}]   ;;  %s1487_s7 = inlined_call_operand.vmem [shape: f32[3,8,1], index: 7, kind: input, shape index: {}]   ;;  %s1488_s8 = inlined_call_operand.vmem [shape: f32[2,10,256], index: 8, kind: output, shape index: {0}]   ;;  %s1489_s9 = inlined_call_operand.vmem [shape: f32[2,14,256], index: 9, kind: output, shape index: {1}]  }
   0x1   :  { %17 = vsyncpa [#allocation3 + $0x1], 0  ;;  %s1258_s30 = smov 0   ;;  %s1260_s10 = smov 0  }
   0x2   :  { %s1262_s11 = smov 0   ;;  %s1264_s12 = smov 0  }
   0x3   :  { %s1266_s13 = smov 0   ;;  %s1268_s14 = smov 0  }
   0x4 LB: > { %s1022_s15 = sadd.s32 4294967295, %s1202_s14   ;;  %s35_s16 = sadd.s32 1, %s1198_s13  ;;  %s1202_s14 = sphi %s1268_s14, %s23_s14   ;;  %s1198_s13 = sphi %s1266_s13, %s1497_s13   ;;  %s1194_s12 = sphi %s1264_s12, %s1496_s12   ;;  %s1190_s11 = sphi %s1262_s11, %s1495_s11   ;;  %s1186_s10 = sphi %s1260_s10, %s1494_s10   ;;  %s1182_s30 = sphi %s1258_s30, %s1493_s30  }
   0x5   : > { %p37_p0 = scmp.ge.s32.totalorder %s35_s16, 2  ;;  %s44_s17 = sadd.s32 1, %s1190_s11 }
   0x6   : > { %p51_p1 = scmp.ne.s32.totalorder %s1190_s11, %s1186_s10  ;;  %p52_p2 = scmp.eq.s32.totalorder %s1202_s14, 0 }
   0x7   : > { %s1499_s16 = smov (%p37_p0, %s35_s16), 0  ;;  %p57_p4 = scmp.ne.s32.totalorder %s1186_s10, %s1182_s30 }
   0x8   : > { %p1294_p3 = por %p52_p2, %p51_p1  ;;  %s39_s19 = ssub.s32 %s1198_s13, %s1499_s16 }
   0x9   : > { %p58_p5 = scmp.eq.s32.totalorder %s1022_s15, 0  ;;  %p42_p6 = scmp.eq.s32.totalorder %s39_s19, 0 }
   0xa   : > { %p1056_p8 = scmp.lt.s32.totalorder %s1202_s14, 2  ;;  %s305_s22 = sand.u32 1, %s1190_s11  }
   0xb   : > { %p1301_p7 = por %p58_p5, %p57_p4  ;;  %s1047_s23 = sshll.u32 %s1198_s13, 10 }
   0xc   : > { %s1307_s21 = scalar_select %p42_p6, %s1190_s11, %s44_s17  }
   0xd   : > { %s1026_s24 = sshll.u32 %s305_s22, 6  ;;  %s1314_s27 = scalar_lea.hbm %s1480_s0, %s1047_s23 }
   0xe   : > { %s309_s28 = scalar_lea.vmem [#allocation2], %s1026_s24  ;;  %p1318_p9 = pnand %p1056_p8, %p1294_p3 }
   0xf   : > { %s318_s29 = sshll.u32 %s309_s28, 4  ;;  %s1324_s15 = scalar_lea.sflag [#allocation3], %s305_s22  ;;  %s1322_s29 = int_to_ptr.vmem [resolvable:$true] %s318_s29 }
  0x10   : > { %s1122_s17 = scalar_lea.hbm %s1314_s27, 1024  ;;  %p1124_p11 = pneg %p1318_p9 }
  0x11   : > { %p1123_p10 = scmp.ne.s32.totalorder %s1314_s27, %s1122_s17  ;;  %s1127_s23 = scalar_lea.hbm %s1480_s0, 2048 }
  0x12   : > { %p1128_p0 = scmp.lt.u32.totalorder %s1314_s27, %s1480_s0  ;;  %p1129_p1 = scmp.lt.u32.totalorder %s1127_s23, %s1122_s17 }
  0x13   : > { %p1125_p12 = pnand %p1124_p11, %p1123_p10  ;;  %p1131_p3 = scmp.lt.u32.totalorder %s1122_s17, %s1314_s27 }
  0x14   : > { %p1130_p2 = por %p1129_p1, %p1128_p0 }
  0x15   : > { %p1126_p13 = pneg %p1125_p12 }
  0x16   : > { %p1132_p4 = por %p1131_p3, %p1130_p2 }
  0x18   : > { %p1133_p5 = pnand %p1132_p4, %p1126_p13 }
  0x1a   : > { %1136 = shalt.err (!%p1133_p5)
}
  0x1b   : > { %s1137_s22 = scalar_lea.vmem %s1322_s29, 1024  ;;  %s1204_s26 = smov [#allocation2]  }
  0x1c   : > { %p1138_p6 = scmp.ne.s32.totalorder %s1322_s29, %s1137_s22  ;;  %s1142_s28 = sshll.u32 %s1204_s26, 4  ;;  %s1143_s28 = int_to_ptr.vmem [resolvable:$false] %s1142_s28 }
  0x1d   : > { %s1144_s19 = scalar_lea.vmem %s1143_s28, 2048  ;;  %p1145_p12 = scmp.lt.s32.totalorder %s1322_s29, %s1143_s28 }
  0x1e   : > { %p1140_p8 = pnand %p1138_p6, %p1124_p11  ;;  %p1146_p0 = scmp.lt.s32.totalorder %s1144_s19, %s1137_s22 }
  0x20   : > { %p1141_p10 = pneg %p1140_p8  ;;  %p1147_p1 = por %p1146_p0, %p1145_p12 }
  0x22   : > { %p1148_p2 = pnand %p1147_p1, %p1141_p10 }
  0x24   : > { %1151 = shalt.err (!%p1148_p2)
}
  0x25   : > { %s1205_s17 = smov 256   ;;  %s1206_s18 = smov 16  }
  0x26   : > { %1055 = dma.hbm_to_vmem [thread:$0]  (!%p1318_p9), %s1314_s27, 1024, %s1322_s29, %s1324_s15, %s1205_s17, %s1205_s17, %s1206_s18  }
  0x27   : > { %p1029_p11 = scmp.ge.s32.totalorder %s1202_s14, 1  ;;  %p326_p13 = scmp.lt.s32.totalorder %s1202_s14, 3 }
  0x29   : > { %p327_p3 = pnand %p1029_p11, %p326_p13 }
  0x2a   : > { %s332_s23 = sand.u32 (!%p327_p3), 1, %s1186_s10  }
  0x2b   : > { %330 = sbr.rel (%p327_p3) target bundleno = 811 (0x32b), region = 52  ;;  %s1030_s24 = sshll.u32 (!%p327_p3), %s332_s23, 6 }
  0x2c   : > { %s333_s25 = scalar_lea.sflag (!%p327_p3), [#allocation3], %s332_s23  ;;  %s336_s22 = scalar_lea.vmem (!%p327_p3), [#allocation2], %s1030_s24 }
  0x32   : > { %1177 = dma.done.wait (%p1301_p7), %s333_s25, 1024  }
  0x33   : > { %1179 = vsyncadd (%p1301_p7), %s333_s25, 4294966272  ;;  %v1207_v0 = vmov 0   ;;  %v407_v1 = vld [vmem:[%s336_s22 + $0x8] sm:$0xff]  ;;  %v409_v2 = vld [vmem:[%s336_s22 + $0x18] sm:$0xff]  ;;  %vm456_vm0 = vcmask 261120   ;;  %vm618_vm1 = vcmask 130048  }
  0x34   : > { %495 = vmatprep.mubr.bf16.mxu0 %v1207_v0  ;;  %1108 = vset.pattern.permute.xlu0 %v1207_v0  ;;  %v406_v3 = vld [vmem:[%s336_s22] sm:$0xff]  ;;  %v415_v4 = vpack.c.bf16 %v409_v2, %v407_v1  ;;  %v408_v5 = vld [vmem:[%s336_s22 + $0x10] sm:$0xff]  ;;  %v411_v6 = vld [vmem:[%s336_s22 + $0x28] sm:$0xff]  ;;  %p386_p7 = scmp.lt.s32.totalorder %s1194_s12, 1  ;;  %vm707_vm9 = vcmask 1040384   ;;  %vm778_vm13 = vcmask 1041408  }
  0x35   : > { %1109 = vset.pattern.permute.xlu1 %v1207_v0  ;;  %582 = vmatprep.mubr.bf16.mxu1 %v1207_v0  ;;  %v413_v7 = vld [vmem:[%s336_s22 + $0x38] sm:$0xff]  ;;  %v414_v8 = vpack.c.bf16 %v408_v5, %v406_v3  ;;  %v410_v10 = vld [vmem:[%s336_s22 + $0x20] sm:$0xff]  ;;  %v412_v11 = vld [vmem:[%s336_s22 + $0x30] sm:$0xff] }
  0x36   : > { %v417_v9 = vpack.c.bf16 %v413_v7, %v411_v6  ;;  %463 = vmatprep.subr.bf16.mxu0 %v415_v4  ;;  %v416_v12 = vpack.c.bf16 %v412_v11, %v410_v10  ;;  %v422_v13 = vld [vmem:[%s1482_s2] sm:$0xff]  ;;  %v424_v14 = vld [vmem:[%s1482_s2 + $0x10] sm:$0xff]  ;;  %v423_v15 = vld [vmem:[%s1482_s2 + $0x8] sm:$0xff]  ;;  %s1501_s12 = smov (!%p386_p7, %s1194_s12), 1 }
  0x37   : > { %464 = vmatpush1.bf16.msra.mxu0 %v414_v8  ;;  %428 = vperm.xlu0 %1108, %v422_v13   ;;  %v1110_v16 = vld [vmem:[%s1481_s1] sm:$0xff]   ;;  %v425_v17 = vld [vmem:[%s1482_s2 + $0x18] sm:$0xff]  ;;  %v531_v19 = vld [vmem:[%s1484_s4 + $0x8] sm:$0xff]  ;;  %s1048_s29 = sshll.u32 %s1501_s12, 5 }
  0x38   : > { %465 = vmatprep.subr.bf16.mxu0 %v417_v9  ;;  %438 = vperm.xlu1 %1109, %v424_v14   ;;  %v530_v18 = vld [vmem:[%s1484_s4] sm:$0xff]  ;;  %v1111_v21 = vld [vmem:[%s1481_s1 + $0x8] sm:$0xff]   ;;  %v1044_v24 = vld [vmem:[%s1487_s7 + $0x10] sm:$0xff]  ;;  %s393_s26 = scalar_lea.vmem %s1488_s8, %s1048_s29  ;;  %s1430_s17 = scalar_lea.vmem %s1489_s9, %s1048_s29 }
  0x39   : > { %v601_v20 = vld [vmem:[%s1486_s6] sm:$0xff]  ;;  %v1043_v23 = vld [vmem:[%s1487_s7 + $0x8] sm:$0xff] }
  0x3a   : > { %v714_v22 = vld [vmem:[%s1487_s7] sm:$0xff]  ;;  %v602_v25 = vld [vmem:[%s1486_s6 + $0x8] sm:$0xff] }
  0x3b   : > { %466 = vmatpush1.bf16.msra.mxu0 %v416_v12  ;;  %433 = vperm.xlu0 %1108, %v423_v15   ;;  %v1112_v58 = vld [vmem:[%s1483_s3] sm:$0xff]  }
  0x3c   : > { %443 = vperm.xlu1 %1109, %v425_v17  }
  0x3e   : > { %1037 = vmatmul.mubr.msk.bf16.vlgmr.msra.gmra.mrb[0].mxu0 %vm456_vm0, %v1110_v16 }
  0x3f   : > { %505 = vmatprep.mubr.bf16.mxu0 %v1207_v0  ;;  %534 = vperm.xlu0 %1108, %v530_v18  }
  0x40   : > { %539 = vperm.xlu1 %1109, %v531_v19  }
  0x43   : > { %605 = vperm.xlu0 %1108, %v601_v20  }
  0x44   : > { %717 = vperm.xlu1 %1109, %v714_v22  }
  0x46   : > { %1038 = vmatmul.mubr.msk.bf16.gmra.mrb[4].mxu0 %vm456_vm0, %v1111_v21 }
  0x47   : > { %738 = vperm.xlu0 %1108, %v1043_v23  }
  0x48   : > { %759 = vperm.xlu1 %1109, %v1044_v24  }
  0x4b   : > { %610 = vperm.xlu0 %1108, %v602_v25  }
  0xb6   : > { %v429_v26 = vpop.permute.xlu0 %428 }
  0xb7   : > { %v439_v35 = vpop.permute.xlu1 %438 }
  0xba   : > { %v434_v30 = vpop.permute.xlu0 %433 }
  0xbb   : > { %v444_v46 = vpop.permute.xlu1 %443 }
  0xbe   : > { %v535_v59 = vpop.permute.xlu0 %534 }
  0xbf   : > { %v540_v63 = vpop.permute.xlu1 %539 }
  0xc2   : > { %v606_v12 = vpop.permute.xlu0 %605 }
  0xc6   : > { %v1417_v13 = vpop.permute.xlu0 %738 }
  0xca   : > { %v611_v17 = vpop.permute.xlu0 %610 }
 0x111   : > { %v497_v27 = vpop.f32.mrb[0].mxu0 }
 0x112   : > { %v498_v28 = vadd.f32 %v497_v27, %v429_v26  ;;  %v499_v29 = vpop.f32.mrb[1].mxu0 }
 0x113   : > { %v500_v31 = vadd.f32 %v499_v29, %v429_v26  ;;  %v501_v32 = vpop.f32.mrb[2].mxu0 }
 0x114   : > { %v502_v33 = vadd.f32 %v501_v32, %v434_v30  ;;  %v503_v34 = vpop.f32.mrb[3].mxu0  ;;  %v516_v37 = vmax.f32 %v498_v28, 0.0  ;;  %v681_v28 = vlaneseq }
 0x115   : > { %v504_v36 = vadd.f32 %v503_v34, %v434_v30  ;;  %v517_v39 = vmax.f32 %v500_v31, 0.0 }
 0x116   : > { %v518_v38 = vmax.f32 %v502_v33, 0.0  ;;  %v682_v33 = vshrl.u32 %v681_v28, 7 }
 0x117   : > { %v519_v40 = vmax.f32 %v504_v36, 0.0 }
 0x118   : > { %v524_v41 = vpack.c.bf16 %v518_v38, %v516_v37 }
 0x119   : > { %v507_v42 = vpop.f32.mrb[4].mxu0  ;;  %v525_v43 = vpack.c.bf16 %v519_v40, %v517_v39 }
 0x11a   : > { %v508_v44 = vadd.f32 %v507_v42, %v439_v35  ;;  %v509_v45 = vpop.f32.mrb[5].mxu0 }
 0x11b   : > { %v510_v47 = vadd.f32 %v509_v45, %v439_v35  ;;  %v511_v48 = vpop.f32.mrb[6].mxu0  ;;  %550 = vmatprep.subr.bf16.mxu1 %v525_v43  ;;  %v718_v45 = vpop.permute.xlu1 %717 }
 0x11c   : > { %v512_v49 = vadd.f32 %v511_v48, %v444_v46  ;;  %v513_v50 = vpop.f32.mrb[7].mxu0  ;;  %551 = vmatpush1.bf16.msra.mxu1 %v524_v41  ;;  %v520_v52 = vmax.f32 %v508_v44, 0.0 }
 0x11d   : > { %v514_v51 = vadd.f32 %v513_v50, %v444_v46  ;;  %v521_v54 = vmax.f32 %v510_v47, 0.0 }
 0x11e   : > { %v522_v53 = vmax.f32 %v512_v49, 0.0 }
 0x11f   : > { %v523_v55 = vmax.f32 %v514_v51, 0.0  ;;  %v760_v51 = vpop.permute.xlu1 %759 }
 0x120   : > { %v526_v56 = vpack.c.bf16 %v522_v53, %v520_v52 }
 0x121   : > { %v527_v57 = vpack.c.bf16 %v523_v55, %v521_v54 }
 0x123   : > { %552 = vmatprep.subr.bf16.mxu1 %v527_v57 }
 0x124   : > { %553 = vmatpush1.bf16.msra.mxu1 %v526_v56 }
 0x127   : > { %1040 = vmatmul.mubr.msk.bf16.vlgmr.msra.gmra.mrb[0].mxu1 %vm456_vm0, %v1112_v58 }
 0x128   : > { %654 = vmatprep.mubr.bf16.mxu1 %v1207_v0  ;;  %v1113_v0 = vld [vmem:[%s1485_s5] sm:$0xff]  }
 0x1fa   : > { %v584_v60 = vpop.f32.mrb[0].mxu1 }
 0x1fb   : > { %v585_v61 = vadd.f32 %v584_v60, %v535_v59  ;;  %v586_v62 = vpop.f32.mrb[1].mxu1 }
 0x1fc   : > { %v587_v1 = vadd.f32 %v586_v62, %v535_v59  ;;  %v588_v2 = vpop.f32.mrb[2].mxu1 }
 0x1fd   : > { %v589_v3 = vadd.f32 %v588_v2, %v540_v63  ;;  %v590_v4 = vpop.f32.mrb[3].mxu1  ;;  %v593_v6 = vmax.f32 %v585_v61, 0.0 }
 0x1fe   : > { %v591_v5 = vadd.f32 %v590_v4, %v540_v63  ;;  %v594_v8 = vmax.f32 %v587_v1, 0.0 }
 0x1ff   : > { %v595_v7 = vmax.f32 %v589_v3, 0.0 }
 0x200   : > { %v596_v9 = vmax.f32 %v591_v5, 0.0 }
 0x201   : > { %v597_v10 = vpack.c.bf16 %v595_v7, %v593_v6 }
 0x202   : > { %v598_v11 = vpack.c.bf16 %v596_v9, %v594_v8 }
 0x204   : > { %622 = vmatprep.subr.bf16.mxu1 %v598_v11 }
 0x205   : > { %623 = vmatpush1.bf16.msra.mxu1 %v597_v10 }
 0x208   : > { %1042 = vmatmul.mubr.msk.bf16.vlgmr.msra.gmra.mrb[4].mxu1 %vm618_vm1, %v1113_v0 }
 0x2db   : > { %v656_v14 = vpop.f32.mrb[4].mxu1 }
 0x2dc   : > { %v657_v15 = vadd.f32 %v656_v14, %v606_v12  ;;  %v658_v16 = vpop.f32.mrb[5].mxu1 }
 0x2dd   : > { %v659_v18 = vadd.f32 %v658_v16, %v606_v12  ;;  %v660_v19 = vpop.f32.mrb[6].mxu1 }
 0x2de   : > { %665 = vst [vmem:[%s393_s26] sm:$0xff] %v657_v15  ;;  %v669_v20 = vrot.slane %v657_v15, 4  ;;  %v661_v21 = vadd.f32 %v660_v19, %v611_v17  ;;  %v662_v22 = vpop.f32.mrb[7].mxu1 }
 0x2df   : > { %666 = vst [vmem:[%s393_s26 + $0x8] sm:$0xff] %v659_v18  ;;  %v675_v23 = vrot.slane %v659_v18, 4  ;;  %v663_v24 = vadd.f32 %v662_v22, %v611_v17 }
 0x2e0   : > { %v670_v25 = vmax.f32 %v657_v15, %v669_v20  ;;  %667 = vst [vmem:[%s393_s26 + $0x10] sm:$0x3] %v661_v21 }
 0x2e1   : > { %v676_v26 = vmax.f32 %v659_v18, %v675_v23  ;;  %668 = vst [vmem:[%s393_s26 + $0x18] sm:$0x3] %v663_v24 }
 0x2e2   : > { %v671_v27 = vrot.slane %v670_v25, 2 }
 0x2e3   : > { %v677_v29 = vrot.slane %v676_v26, 2 }
 0x2e4   : > { %v672_v30 = vmax.f32 %v670_v25, %v671_v27 }
 0x2e5   : > { %v678_v31 = vmax.f32 %v676_v26, %v677_v29 }
 0x2e6   : > { %v673_v32 = vrot.slane %v672_v30, 1 }
 0x2e7   : > { %v679_v34 = vrot.slane %v678_v31, 1 }
 0x2e8   : > { %v674_v35 = vmax.f32 %v672_v30, %v673_v32 }
 0x2e9   : > { %v680_v36 = vmax.f32 %v678_v31, %v679_v34 }
 0x2ea   : > { %vm683_vm2 = vcmp.eq.f32.partialorder %v657_v15, %v674_v35 }
 0x2eb   : > { %v685_v37 = vsel %vm683_vm2, %v682_v33, 8  ;;  %vm684_vm3 = vcmp.eq.f32.partialorder %v659_v18, %v680_v36 }
 0x2ec   : > { %v687_v38 = vrot.slane %v685_v37, 4  ;;  %v686_v39 = vsel %vm684_vm3, %v682_v33, 8 }
 0x2ed   : > { %v696_v40 = vrot.slane %v686_v39, 4 }
 0x2ee   : > { %vm688_vm4 = vcmp.lt.s32.totalorder %v685_v37, %v687_v38 }
 0x2ef   : > { %v689_v41 = vsel %vm688_vm4, %v685_v37, %v687_v38  ;;  %vm697_vm5 = vcmp.lt.s32.totalorder %v686_v39, %v696_v40 }
 0x2f0   : > { %v690_v42 = vrot.slane %v689_v41, 2  ;;  %v698_v43 = vsel %vm697_vm5, %v686_v39, %v696_v40 }
 0x2f1   : > { %v699_v44 = vrot.slane %v698_v43, 2 }
 0x2f2   : > { %vm691_vm6 = vcmp.lt.s32.totalorder %v689_v41, %v690_v42 }
 0x2f3   : > { %v692_v46 = vsel %vm691_vm6, %v689_v41, %v690_v42  ;;  %vm700_vm7 = vcmp.lt.s32.totalorder %v698_v43, %v699_v44 }
 0x2f4   : > { %v693_v47 = vrot.slane %v692_v46, 1  ;;  %v701_v48 = vsel %vm700_vm7, %v698_v43, %v699_v44 }
 0x2f5   : > { %v702_v49 = vrot.slane %v701_v48, 1 }
 0x2f6   : > { %vm694_vm8 = vcmp.lt.s32.totalorder %v692_v46, %v693_v47 }
 0x2f7   : > { %v695_v50 = vsel %vm694_vm8, %v692_v46, %v693_v47  ;;  %vm703_vm10 = vcmp.lt.s32.totalorder %v701_v48, %v702_v49 }
 0x2f8   : > { %v705_v52 = vcvt.s32.f32 %v695_v50  ;;  %vm712_vm11 = vcmp.eq.s32.totalorder %v682_v33, %v695_v50  ;;  %v704_v53 = vsel %vm703_vm10, %v701_v48, %v702_v49 }
 0x2f9   : > { %v720_v54 = vsel %vm712_vm11, %v718_v45, 0.0  ;;  %v741_v55 = vsel %vm712_vm11, %v1417_v13, 0.0  ;;  %v762_v56 = vsel %vm712_vm11, %v760_v51, 0.0  ;;  %v706_v57 = vcvt.s32.f32 %v704_v53 }
 0x2fa   : > { %v708_v58 = vsel %vm707_vm9, %v674_v35, %v705_v52  ;;  %v722_v59 = vrot.slane %v720_v54, 4  ;;  %v743_v60 = vrot.slane %v741_v55, 4  ;;  %v764_v61 = vrot.slane %v762_v56, 4 }
 0x2fb   : > { %710 = vst [vmem:[%s1430_s17] sm:$0x3] %v708_v58  ;;  %v709_v62 = vsel %vm707_vm9, %v680_v36, %v706_v57  ;;  %vm713_vm12 = vcmp.eq.s32.totalorder %v682_v33, %v704_v53 }
 0x2fc   : > { %v723_v63 = vadd.f32 %v722_v59, %v720_v54  ;;  %v744_v1 = vadd.f32 %v743_v60, %v741_v55  ;;  %v765_v2 = vadd.f32 %v764_v61, %v762_v56  ;;  %711 = vst [vmem:[%s1430_s17 + $0x8] sm:$0x3] %v709_v62  ;;  %v721_v3 = vsel %vm713_vm12, %v718_v45, 0.0 }
 0x2fd   : > { %v728_v4 = vrot.slane %v721_v3, 4  ;;  %v742_v5 = vsel %vm713_vm12, %v1417_v13, 0.0  ;;  %v763_v6 = vsel %vm713_vm12, %v760_v51, 0.0 }
 0x2fe   : > { %v724_v7 = vrot.slane %v723_v63, 2  ;;  %v745_v8 = vrot.slane %v744_v1, 2  ;;  %v766_v9 = vrot.slane %v765_v2, 2  ;;  %v749_v10 = vrot.slane %v742_v5, 4 }
 0x2ff   : > { %v729_v11 = vadd.f32 %v728_v4, %v721_v3  ;;  %v770_v0 = vrot.slane %v763_v6, 4 }
 0x300   : > { %v725_v12 = vadd.f32 %v724_v7, %v723_v63  ;;  %v746_v14 = vadd.f32 %v745_v8, %v744_v1  ;;  %v767_v15 = vadd.f32 %v766_v9, %v765_v2  ;;  %v750_v16 = vadd.f32 %v749_v10, %v742_v5 }
 0x301   : > { %v730_v17 = vrot.slane %v729_v11, 2  ;;  %v771_v18 = vadd.f32 %v770_v0, %v763_v6 }
 0x302   : > { %v726_v19 = vrot.slane %v725_v12, 1  ;;  %v747_v20 = vrot.slane %v746_v14, 1  ;;  %v768_v21 = vrot.slane %v767_v15, 1  ;;  %v751_v22 = vrot.slane %v750_v16, 2 }
 0x303   : > { %v731_v23 = vadd.f32 %v730_v17, %v729_v11  ;;  %v772_v13 = vrot.slane %v771_v18, 2 }
 0x304   : > { %v727_v24 = vadd.f32 %v726_v19, %v725_v12  ;;  %v748_v25 = vadd.f32 %v747_v20, %v746_v14  ;;  %v769_v26 = vadd.f32 %v768_v21, %v767_v15  ;;  %v752_v27 = vadd.f32 %v751_v22, %v750_v16 }
 0x305   : > { %v732_v28 = vrot.slane %v731_v23, 1  ;;  %v773_v29 = vadd.f32 %v772_v13, %v771_v18 }
 0x306   : > { %v776_v30 = vsel %vm707_vm9, %v727_v24, %v748_v25  ;;  %v789_v31 = vsub.f32 0.0, %v727_v24  ;;  %v791_v32 = vsub.f32 0.0, %v748_v25  ;;  %v793_v33 = vsub.f32 0.0, %v769_v26 }
 0x307   : > { %v779_v34 = vsel %vm778_vm13, %v776_v30, %v769_v26  ;;  %v733_v35 = vadd.f32 %v732_v28, %v731_v23  ;;  %v753_v36 = vrot.slane %v752_v27, 1  ;;  %v774_v37 = vrot.slane %v773_v29, 1 }
 0x308   : > { %v783_v38 = vrot.slane %v779_v34, 6  ;;  %v795_v39 = vmul.f32 %v789_v31, %v789_v31  ;;  %v797_v40 = vmul.f32 %v791_v32, %v791_v32  ;;  %v813_v41 = vsub.f32 0.0, %v791_v32 }
 0x309   : > { %vm815_vm14 = vcmp.eq.f32.partialorder %v789_v31, 0.0  ;;  %vm817_vm15 = vcmp.eq.f32.partialorder %v791_v32, 0.0  ;;  %v754_v42 = vadd.f32 %v753_v36, %v752_v27  ;;  %v801_v44 = vmul.f32 %v793_v33, %v793_v33 }
 0x30a   : > { %787 = vst [vmem:[%s1430_s17] sm:$0x1c] %v783_v38  ;;  %v799_v43 = vadd.f32 %v797_v40, %v795_v39  ;;  %vm819_vm0 = vmand %vm815_vm14, %vm817_vm15  ;;  %v775_v45 = vadd.f32 %v774_v37, %v773_v29  ;;  %v790_v46 = vsub.f32 0.0, %v733_v35  ;;  %v823_v48 = vmul.f32 %v813_v41, %v813_v41 }
 0x30b   : > { %v821_v47 = vsel %vm819_vm0, 1.0, %v789_v31  ;;  %v777_v49 = vsel %vm707_vm9, %v733_v35, %v754_v42  ;;  %v792_v50 = vsub.f32 0.0, %v754_v42 }
 0x30c   : > { %v803_v51 = vadd.f32 %v801_v44, %v799_v43  ;;  %v825_v52 = vmul.f32 %v821_v47, %v821_v47  ;;  %v780_v53 = vsel %vm778_vm13, %v777_v49, %v775_v45  ;;  %v794_v54 = vsub.f32 0.0, %v775_v45 }
 0x30d   : > { %v784_v55 = vrot.slane %v780_v53, 6  ;;  %v796_v56 = vmul.f32 %v790_v46, %v790_v46  ;;  %v798_v57 = vmul.f32 %v792_v50, %v792_v50  ;;  %v814_v58 = vsub.f32 0.0, %v792_v50 }
 0x30e   : > { %1114 = vrsqrt.f32 %v803_v51  ;;  %v827_v59 = vadd.f32 %v825_v52, %v823_v48  ;;  %vm816_vm1 = vcmp.eq.f32.partialorder %v790_v46, 0.0  ;;  %v802_v61 = vmul.f32 %v794_v54, %v794_v54 }
 0x30f   : > { %788 = vst [vmem:[%s1430_s17 + $0x8] sm:$0x1c] %v784_v55  ;;  %v800_v60 = vadd.f32 %v798_v57, %v796_v56  ;;  %vm818_vm2 = vcmp.eq.f32.partialorder %v792_v50, 0.0  ;;  %v824_v62 = vmul.f32 %v814_v58, %v814_v58 }
 0x310   : > { %1116 = vrsqrt.f32 %v827_v59  ;;  %vm820_vm3 = vmand %vm816_vm1, %vm818_vm2 }
 0x311   : > { %v804_v63 = vadd.f32 %v802_v61, %v800_v60  ;;  %v822_v1 = vsel %vm820_vm3, 1.0, %v790_v46 }
 0x312   : > { %v826_v2 = vmul.f32 %v822_v1, %v822_v1 }
 0x313   : > { %1118 = vrsqrt.f32 %v804_v63 }
 0x314   : > { %v828_v3 = vadd.f32 %v826_v2, %v824_v62 }
 0x316   : > { %1120 = vrsqrt.f32 %v828_v3 }
 0x318   : > { %v1115_v4 = vpop.eup %1114 }
 0x319   : > { %v807_v5 = vmul.f32 %v1115_v4, %v789_v31  ;;  %v809_v6 = vmul.f32 %v1115_v4, %v791_v32  ;;  %v811_v7 = vmul.f32 %v1115_v4, %v793_v33 }
 0x31a   : > { %v1117_v8 = vpop.eup %1116 }
 0x31b   : > { %v831_v9 = vmul.f32 %v1117_v8, %v813_v41  ;;  %v833_v10 = vmul.f32 %v1117_v8, %v821_v47  ;;  %v835_v11 = vsub.f32 0.0, %v811_v7  ;;  %v865_v26 = vsel %vm707_vm9, %v811_v7, 0.0 }
 0x31d   : > { %v1119_v0 = vpop.eup %1118  ;;  %v837_v12 = vmul.f32 %v835_v11, %v833_v10  ;;  %v839_v14 = vmul.f32 %v831_v9, %v811_v7  ;;  %v841_v15 = vmul.f32 %v833_v10, %v807_v5  ;;  %v843_v16 = vmul.f32 %v831_v9, %v809_v6 }
 0x31e   : > { %v847_v17 = vsel %vm707_vm9, %v807_v5, %v831_v9  ;;  %v859_v18 = vsel %vm707_vm9, %v809_v6, %v833_v10  ;;  %v808_v19 = vmul.f32 %v1119_v0, %v790_v46  ;;  %v810_v20 = vmul.f32 %v1119_v0, %v792_v50 }
 0x31f   : > { %v845_v21 = vsub.f32 %v841_v15, %v843_v16  ;;  %v849_v22 = vsel %vm778_vm13, %v847_v17, %v837_v12  ;;  %v861_v23 = vsel %vm778_vm13, %v859_v18, %v839_v14  ;;  %v812_v13 = vmul.f32 %v1119_v0, %v794_v54 }
 0x320   : > { %v1121_v24 = vpop.eup %1120  ;;  %v853_v25 = vrot.slane %v849_v22, 3  ;;  %863 = vst [vmem:[%s1430_s17 + $0x10] sm:$0x7] %v861_v23 }
 0x321   : > { %v867_v27 = vsel %vm778_vm13, %v865_v26, %v845_v21  ;;  %v832_v28 = vmul.f32 %v1121_v24, %v814_v58  ;;  %v834_v29 = vmul.f32 %v1121_v24, %v822_v1  ;;  %v836_v30 = vsub.f32 0.0, %v812_v13 }
 0x322   : > { %857 = vst [vmem:[%s1430_s17] sm:$0xe0] %v853_v25  ;;  %v871_v31 = vrot.slane %v867_v27, 5  ;;  %v866_v42 = vsel %vm707_vm9, %v812_v13, 0.0 }
 0x323   : > { %v838_v32 = vmul.f32 %v836_v30, %v834_v29  ;;  %v840_v33 = vmul.f32 %v832_v28, %v812_v13  ;;  %v842_v34 = vmul.f32 %v834_v29, %v808_v19  ;;  %v844_v35 = vmul.f32 %v832_v28, %v810_v20 }
 0x324   : > { %875 = vst [vmem:[%s1430_s17 + $0x10] sm:$0x38] %v871_v31  ;;  %v848_v36 = vsel %vm707_vm9, %v808_v19, %v832_v28  ;;  %v860_v37 = vsel %vm707_vm9, %v810_v20, %v834_v29 }
 0x325   : > { %v846_v38 = vsub.f32 %v842_v34, %v844_v35  ;;  %v850_v39 = vsel %vm778_vm13, %v848_v36, %v838_v32  ;;  %v862_v40 = vsel %vm778_vm13, %v860_v37, %v840_v33 }
 0x326   : > { %v854_v41 = vrot.slane %v850_v39, 3  ;;  %864 = vst [vmem:[%s1430_s17 + $0x18] sm:$0x7] %v862_v40 }
 0x327   : > { %v868_v43 = vsel %vm778_vm13, %v866_v42, %v846_v38 }
 0x328   : > { %858 = vst [vmem:[%s1430_s17 + $0x8] sm:$0xe0] %v854_v41  ;;  %v872_v44 = vrot.slane %v868_v43, 5 }
 0x32a   : > { %876 = vst [vmem:[%s1430_s17 + $0x18] sm:$0x38] %v872_v44 }
 0x32b PF: > { %s23_s14 = sadd.s32 1, %s1202_s14   ;;  %s1493_s30 = smov %s1186_s10 }
 0x32c   : > { %p20_p9 = scmp.ge.s32.totalorder %s23_s14, 4   ;;  %s1494_s10 = smov %s1190_s11 }
 0x32d   : > { %s1495_s11 = smov %s1307_s21  ;;  %s1496_s12 = smov %s1198_s13 }
 0x32e   : > { %s1497_s13 = smov %s1499_s16  ;;  %22 = sbr.rel (!%p20_p9) target bundleno = 4 (0x4), region = 106 }
 0x335   :  { %932 = vsyncpa [#allocation3], 1 }
 0x336   :  { %934 = vsyncpa [#allocation3 + $0x1], 1 }

</bundles_post_ra>
